<compile_context>
chip_gen: v5e
topology: v5e:2x2
jax: 0.10.0
libtpu: 0.0.40
codegen_flags: <defaults>
</compile_context>

<pallas_src>
import functools

import jax
import jax.numpy as jnp
from jax.experimental import pallas as pl
from jax.experimental.pallas import tpu as pltpu


def _ohem_ce_kernel(score_ref, target_ref, loss_ref, *, ignore_label):
    """Per-pixel cross-entropy loss.

    score_ref : (C, R, 128) float  -- C channel planes of (R, 128) pixels
    target_ref: (R, 128) int32
    loss_ref  : (R, 128) float32   -- -log softmax(score)[target]; 0 where ignored
    """
    c = score_ref.shape[0]
    tgt = target_ref[...]                                  # (R, 128)
    valid = tgt != ignore_label                            # (R, 128)

    # Pass 1: channel max for numerical stability.  Static unroll over C ->
    # dense (R, 128) VALU maxes, nothing lives longer than one plane.
    m = score_ref[0].astype(jnp.float32)
    for ci in range(1, c):
        m = jnp.maximum(m, score_ref[ci].astype(jnp.float32))

    # Pass 2: sum of exp and the target-class shifted logit, fused per channel.
    # ignore_label matches no channel index (and if it did, the final select
    # zeroes those pixels anyway), so no pre-clamp of the target is needed.
    sum_exp = jnp.zeros_like(m)
    true_shifted = jnp.zeros_like(m)
    for ci in range(c):
        s = score_ref[ci].astype(jnp.float32) - m
        sum_exp = sum_exp + jnp.exp(s)
        true_shifted = true_shifted + jnp.where(tgt == ci, s, 0.0)

    loss = jnp.log(sum_exp) - true_shifted                 # == -log p_true
    loss_ref[...] = jnp.where(valid, loss, 0.0)


def ohem_cross_entropy(score_nchw, target_nhw, *, ignore_label=-1, thres=0.7,
                       min_kept=100000, tile=32768):
    n, c, h, w = score_nchw.shape
    th, tw = target_nhw.shape[1], target_nhw.shape[2]
    # TODO(synk): bilinear upsample path (score spatial != target spatial) not implemented.
    assert (h, w) == (th, tw), "score and target spatial sizes must match"
    # TODO(synk): per-class `weight` (None by default in the module) not implemented.
    min_kept = max(1, int(min_kept))

    hw = h * w
    LANE = 128
    PIX_QUANT = 8 * LANE                       # 1024: keeps the row axis a multiple of 8
    score_bytes = jnp.dtype(score_nchw.dtype).itemsize

    # --- pixel-tile selection (pixels per grid step) ---
    # Double-buffered VMEM per step ~= 2 * (C*tile*score_bytes + 2*tile*4).
    # Keep it under ~24 MiB so the kernel fits the (raised) scoped-VMEM budget
    # on every generation, including v7x's 64 MiB parts.
    VMEM_BUDGET = 24 << 20
    per_pixel = 2 * (c * score_bytes + 4 + 4)
    cap = max(PIX_QUANT, (VMEM_BUDGET // per_pixel) // PIX_QUANT * PIX_QUANT)

    if hw <= PIX_QUANT:
        # Tiny input: single tile; the row axis equals its full extent so the
        # (8, 128) block constraint is satisfied trivially.
        tile = ((hw + LANE - 1) // LANE) * LANE
    else:
        hw_q = ((hw + PIX_QUANT - 1) // PIX_QUANT) * PIX_QUANT
        tile = max(PIX_QUANT, min((int(tile) // PIX_QUANT) * PIX_QUANT, cap, hw_q))
        # v7x has 2 TensorCores sharing the ("parallel","parallel") grid: keep
        # at least a few total steps so neither core sits idle.
        MIN_STEPS = 4
        while n * ((hw + tile - 1) // tile) < MIN_STEPS and tile > PIX_QUANT:
            tile -= PIX_QUANT

    hwp = ((hw + tile - 1) // tile) * tile
    rows_total = hwp // LANE
    rows_block = tile // LANE

    # Free row-major reshapes (no HBM transpose).
    score = score_nchw.reshape(n, c, hw)
    target = target_nhw.reshape(n, hw).astype(jnp.int32)
    pad = hwp - hw
    if pad:
        # Rare fallback (typical H*W is a multiple of the tile); padded pixels
        # are marked ignored and sliced off before the glue.
        score = jnp.pad(score, ((0, 0), (0, 0), (0, pad)))
        target = jnp.pad(target, ((0, 0), (0, pad)), constant_values=ignore_label)
    score = score.reshape(n, c, rows_total, LANE)
    target = target.reshape(n, rows_total, LANE)

    kernel = functools.partial(_ohem_ce_kernel, ignore_label=ignore_label)
    loss = pl.pallas_call(
        kernel,
        out_shape=jax.ShapeDtypeStruct((n, rows_total, LANE), jnp.float32),
        grid_spec=pltpu.PrefetchScalarGridSpec(
            num_scalar_prefetch=0,
            grid=(n, rows_total // rows_block),
            in_specs=[
                pl.BlockSpec((None, c, rows_block, LANE),
                             lambda b, i: (b, 0, i, 0)),
                pl.BlockSpec((None, rows_block, LANE),
                             lambda b, i: (b, i, 0)),
            ],
            out_specs=pl.BlockSpec((None, rows_block, LANE),
                                   lambda b, i: (b, i, 0))),
        compiler_params=pltpu.CompilerParams(
            dimension_semantics=("parallel", "parallel"),
            vmem_limit_bytes=32 << 20),
    )(score, target)

    loss = loss.reshape(n, hwp)[:, :hw].reshape(-1)        # (P,) per-pixel CE

    # --- OHEM threshold selection (JAX glue, entirely in loss space) ---
    # PyTorch: prob = exp(-loss); min_value = k-th smallest valid prob with
    # k = min(min_kept, num_valid-1) (0-indexed); threshold = max(min_value,
    # thres); keep = valid & prob < threshold.  Since prob = exp(-loss) is
    # strictly decreasing this is exactly:
    #   kth_loss  = (min(min_kept, num_valid-1)+1)-th LARGEST valid loss
    #   keep      = valid & loss > min(kth_loss, -log(thres))
    tflat = target_nhw.reshape(-1)
    valid = tflat != ignore_label
    num_valid = jnp.sum(valid.astype(jnp.int32))

    # Exact k-th largest valid loss via a 32-step binary search on the bit
    # pattern (losses are >= 0, so the int32 bit pattern is order-preserving;
    # invalid pixels map to -1 and never count).  Each step is one streaming
    # count reduction -- no full sort / top_k with k ~ 1e5.
    bits = jnp.where(valid, jax.lax.bitcast_convert_type(loss, jnp.int32),
                     jnp.int32(-1))
    k = jnp.minimum(jnp.int32(min_kept) + 1, num_valid)    # 1-indexed rank

    def _bisect(_, lo_hi):
        lo, hi = lo_hi
        mid = lo + (hi - lo + 1) // 2
        cnt = jnp.sum((bits >= mid).astype(jnp.int32))
        take = cnt >= k
        return jnp.where(take, mid, lo), jnp.where(take, hi, mid - 1)

    inf_bits = jnp.int32(0x7F800000)                        # bit pattern of +inf
    lo, _ = jax.lax.fori_loop(0, 32, _bisect, (jnp.int32(0), inf_bits))
    kth_loss = jax.lax.bitcast_convert_type(lo, jnp.float32)

    thr_loss = jnp.minimum(kth_loss, -jnp.log(jnp.float32(thres)))
    keep = (valid & (loss > thr_loss)).astype(jnp.float32)
    kept = jnp.sum(keep)
    # NOTE: PyTorch returns NaN for an empty kept set; guard with 0.0 instead.
    return jnp.where(kept > 0, jnp.sum(loss * keep) / jnp.maximum(kept, 1.0), 0.0)


if __name__ == "__main__":
    key = jax.random.PRNGKey(0)
    n, c, h, w = 2, 4, 16, 16
    k1, k2, k3 = jax.random.split(key, 3)

    score = jax.random.normal(k1, (n, c, h, w), dtype=jnp.float32)
    target = jax.random.randint(k2, (n, h, w), 0, c)
    # Sprinkle some ignore_label pixels.
    ignore_mask = jax.random.uniform(k3, (n, h, w)) < 0.1
    target = jnp.where(ignore_mask, -1, target).astype(jnp.int32)

    out = ohem_cross_entropy(score, target, ignore_label=-1, thres=0.7,
                             min_kept=100000)
    jax.block_until_ready(out)
    print("KERNEL_OK")
</pallas_src>

<mosaic_0001>
module attributes {stable_mosaic.version = 11 : i64} {
  func.func @_ohem_ce_kernel(%arg0: i32, %arg1: i32, %arg2: memref<1x4x2x128xf32, #tpu.memory_space<vmem>>, %arg3: memref<1x2x128xi32, #tpu.memory_space<vmem>>, %arg4: memref<1x2x128xf32, #tpu.memory_space<vmem>>) attributes {dimension_semantics = [#tpu.dimension_semantics<parallel>, #tpu.dimension_semantics<parallel>], iteration_bounds = array<i64: 2, 1>, scalar_prefetch = 0 : i64, scratch_operands = 0 : i64, tpu.core_type = #tpu.core_type<tc>, window_params = [{transform_indices = @transform_0, window_bounds = array<i64: 1, 4, 2, 128>}, {transform_indices = @transform_1, window_bounds = array<i64: 1, 2, 128>}, {transform_indices = @transform_2, window_bounds = array<i64: 1, 2, 128>}]} {
    %c0 = arith.constant 0 : index
    %c0_0 = arith.constant 0 : index
    %c0_1 = arith.constant 0 : index
    %0 = vector.load %arg3[%c0, %c0_0, %c0_1] : memref<1x2x128xi32, #tpu.memory_space<vmem>>, vector<1x2x128xi32>
    %1 = vector.shape_cast %0 : vector<1x2x128xi32> to vector<2x128xi32>
    %c-1_i32 = arith.constant -1 : i32
    %2 = vector.broadcast %c-1_i32 : i32 to vector<2x128xi32>
    %3 = arith.cmpi ne, %1, %2 : vector<2x128xi32>
    %c0_2 = arith.constant 0 : index
    %c0_3 = arith.constant 0 : index
    %c0_4 = arith.constant 0 : index
    %c0_5 = arith.constant 0 : index
    %4 = vector.load %arg2[%c0_2, %c0_3, %c0_4, %c0_5] : memref<1x4x2x128xf32, #tpu.memory_space<vmem>>, vector<1x1x2x128xf32>
    %5 = vector.shape_cast %4 : vector<1x1x2x128xf32> to vector<2x128xf32>
    %c0_6 = arith.constant 0 : index
    %c1 = arith.constant 1 : index
    %c0_7 = arith.constant 0 : index
    %c0_8 = arith.constant 0 : index
    %6 = vector.load %arg2[%c0_6, %c1, %c0_7, %c0_8] : memref<1x4x2x128xf32, #tpu.memory_space<vmem>>, vector<1x1x2x128xf32>
    %7 = vector.shape_cast %6 : vector<1x1x2x128xf32> to vector<2x128xf32>
    %8 = arith.maximumf %5, %7 : vector<2x128xf32>
    %c0_9 = arith.constant 0 : index
    %c2 = arith.constant 2 : index
    %c0_10 = arith.constant 0 : index
    %c0_11 = arith.constant 0 : index
    %9 = vector.load %arg2[%c0_9, %c2, %c0_10, %c0_11] : memref<1x4x2x128xf32, #tpu.memory_space<vmem>>, vector<1x1x2x128xf32>
    %10 = vector.shape_cast %9 : vector<1x1x2x128xf32> to vector<2x128xf32>
    %11 = arith.maximumf %8, %10 : vector<2x128xf32>
    %c0_12 = arith.constant 0 : index
    %c3 = arith.constant 3 : index
    %c0_13 = arith.constant 0 : index
    %c0_14 = arith.constant 0 : index
    %12 = vector.load %arg2[%c0_12, %c3, %c0_13, %c0_14] : memref<1x4x2x128xf32, #tpu.memory_space<vmem>>, vector<1x1x2x128xf32>
    %13 = vector.shape_cast %12 : vector<1x1x2x128xf32> to vector<2x128xf32>
    %14 = arith.maximumf %11, %13 : vector<2x128xf32>
    %cst = arith.constant 0.000000e+00 : f32
    %15 = vector.broadcast %cst : f32 to vector<2x128xf32>
    %cst_15 = arith.constant 0.000000e+00 : f32
    %16 = vector.broadcast %cst_15 : f32 to vector<2x128xf32>
    %c0_16 = arith.constant 0 : index
    %c0_17 = arith.constant 0 : index
    %c0_18 = arith.constant 0 : index
    %c0_19 = arith.constant 0 : index
    %17 = vector.load %arg2[%c0_16, %c0_17, %c0_18, %c0_19] : memref<1x4x2x128xf32, #tpu.memory_space<vmem>>, vector<1x1x2x128xf32>
    %18 = vector.shape_cast %17 : vector<1x1x2x128xf32> to vector<2x128xf32>
    %19 = arith.subf %18, %14 : vector<2x128xf32>
    %20 = math.exp %19 : vector<2x128xf32>
    %21 = arith.addf %15, %20 : vector<2x128xf32>
    %c0_i32 = arith.constant 0 : i32
    %22 = vector.broadcast %c0_i32 : i32 to vector<2x128xi32>
    %23 = arith.cmpi eq, %1, %22 : vector<2x128xi32>
    %cst_20 = arith.constant 0.000000e+00 : f32
    %24 = vector.broadcast %cst_20 : f32 to vector<2x128xf32>
    %25 = arith.select %23, %19, %24 : vector<2x128xi1>, vector<2x128xf32>
    %26 = arith.addf %16, %25 : vector<2x128xf32>
    %c0_21 = arith.constant 0 : index
    %c1_22 = arith.constant 1 : index
    %c0_23 = arith.constant 0 : index
    %c0_24 = arith.constant 0 : index
    %27 = vector.load %arg2[%c0_21, %c1_22, %c0_23, %c0_24] : memref<1x4x2x128xf32, #tpu.memory_space<vmem>>, vector<1x1x2x128xf32>
    %28 = vector.shape_cast %27 : vector<1x1x2x128xf32> to vector<2x128xf32>
    %29 = arith.subf %28, %14 : vector<2x128xf32>
    %30 = math.exp %29 : vector<2x128xf32>
    %31 = arith.addf %21, %30 : vector<2x128xf32>
    %c1_i32 = arith.constant 1 : i32
    %32 = vector.broadcast %c1_i32 : i32 to vector<2x128xi32>
    %33 = arith.cmpi eq, %1, %32 : vector<2x128xi32>
    %cst_25 = arith.constant 0.000000e+00 : f32
    %34 = vector.broadcast %cst_25 : f32 to vector<2x128xf32>
    %35 = arith.select %33, %29, %34 : vector<2x128xi1>, vector<2x128xf32>
    %36 = arith.addf %26, %35 : vector<2x128xf32>
    %c0_26 = arith.constant 0 : index
    %c2_27 = arith.constant 2 : index
    %c0_28 = arith.constant 0 : index
    %c0_29 = arith.constant 0 : index
    %37 = vector.load %arg2[%c0_26, %c2_27, %c0_28, %c0_29] : memref<1x4x2x128xf32, #tpu.memory_space<vmem>>, vector<1x1x2x128xf32>
    %38 = vector.shape_cast %37 : vector<1x1x2x128xf32> to vector<2x128xf32>
    %39 = arith.subf %38, %14 : vector<2x128xf32>
    %40 = math.exp %39 : vector<2x128xf32>
    %41 = arith.addf %31, %40 : vector<2x128xf32>
    %c2_i32 = arith.constant 2 : i32
    %42 = vector.broadcast %c2_i32 : i32 to vector<2x128xi32>
    %43 = arith.cmpi eq, %1, %42 : vector<2x128xi32>
    %cst_30 = arith.constant 0.000000e+00 : f32
    %44 = vector.broadcast %cst_30 : f32 to vector<2x128xf32>
    %45 = arith.select %43, %39, %44 : vector<2x128xi1>, vector<2x128xf32>
    %46 = arith.addf %36, %45 : vector<2x128xf32>
    %c0_31 = arith.constant 0 : index
    %c3_32 = arith.constant 3 : index
    %c0_33 = arith.constant 0 : index
    %c0_34 = arith.constant 0 : index
    %47 = vector.load %arg2[%c0_31, %c3_32, %c0_33, %c0_34] : memref<1x4x2x128xf32, #tpu.memory_space<vmem>>, vector<1x1x2x128xf32>
    %48 = vector.shape_cast %47 : vector<1x1x2x128xf32> to vector<2x128xf32>
    %49 = arith.subf %48, %14 : vector<2x128xf32>
    %50 = math.exp %49 : vector<2x128xf32>
    %51 = arith.addf %41, %50 : vector<2x128xf32>
    %c3_i32 = arith.constant 3 : i32
    %52 = vector.broadcast %c3_i32 : i32 to vector<2x128xi32>
    %53 = arith.cmpi eq, %1, %52 : vector<2x128xi32>
    %cst_35 = arith.constant 0.000000e+00 : f32
    %54 = vector.broadcast %cst_35 : f32 to vector<2x128xf32>
    %55 = arith.select %53, %49, %54 : vector<2x128xi1>, vector<2x128xf32>
    %56 = arith.addf %46, %55 : vector<2x128xf32>
    %57 = math.log %51 : vector<2x128xf32>
    %58 = arith.subf %57, %56 : vector<2x128xf32>
    %cst_36 = arith.constant 0.000000e+00 : f32
    %59 = vector.broadcast %cst_36 : f32 to vector<2x128xf32>
    %60 = arith.select %3, %58, %59 : vector<2x128xi1>, vector<2x128xf32>
    %c0_37 = arith.constant 0 : index
    %c0_38 = arith.constant 0 : index
    %c0_39 = arith.constant 0 : index
    %61 = vector.load %arg4[%c0_37, %c0_38, %c0_39] : memref<1x2x128xf32, #tpu.memory_space<vmem>>, vector<1x2x128xf32>
    %62 = vector.shape_cast %61 : vector<1x2x128xf32> to vector<2x128xf32>
    %63 = vector.shape_cast %60 : vector<2x128xf32> to vector<1x2x128xf32>
    tpu.vector_store %arg4[%c0_37, %c0_38, %c0_39], %63 {strides = array<i32>} : memref<1x2x128xf32, #tpu.memory_space<vmem>>, vector<1x2x128xf32>,
    return
  }
  func.func @transform_0(%arg0: i32, %arg1: i32) -> (i32, i32, i32, i32) {
    %c0_i32 = arith.constant 0 : i32
    %c0_i32_0 = arith.constant 0 : i32
    %c0_i32_1 = arith.constant 0 : i32
    return %arg0, %c0_i32, %arg1, %c0_i32_0 : i32, i32, i32, i32
  }
  func.func @transform_1(%arg0: i32, %arg1: i32) -> (i32, i32, i32) {
    %c0_i32 = arith.constant 0 : i32
    %c0_i32_0 = arith.constant 0 : i32
    return %arg0, %arg1, %c0_i32 : i32, i32, i32
  }
  func.func @transform_2(%arg0: i32, %arg1: i32) -> (i32, i32, i32) {
    %c0_i32 = arith.constant 0 : i32
    %c0_i32_0 = arith.constant 0 : i32
    return %arg0, %arg1, %c0_i32 : i32, i32, i32
  }
}

</mosaic_0001>

<bundles_post_ra>
// kernel: tpu_custom_call.1
= control target key start
LH: loop header
LB: loop body
LE: loop exit
PB: predicated region body
PF: predicated region fallthrough
CT: control target
= control target key end

     0   :  { %7 = vsyncpa [#allocation3], 0  ;;  %s797_s0 = inlined_call_operand.hbm [shape: f32[2,4,2,128], index: 0, kind: input, shape index: {}]   ;;  %s798_s1 = inlined_call_operand.hbm [shape: s32[2,2,128], index: 1, kind: input, shape index: {}]   ;;  %s799_s2 = inlined_call_operand.hbm [shape: f32[2,2,128], index: 2, kind: output, shape index: {}]  }
   0x1   :  { %9 = vsyncpa [#allocation3 + $0x1], 0 }
   0x2   :  { %10 = vsyncpa [#allocation6], 0 }
   0x3   :  { %12 = vsyncpa [#allocation6 + $0x1], 0 }
   0x4   :  { %13 = vsyncpa [#allocation4], 0 }
   0x5   :  { %15 = vsyncpa [#allocation4 + $0x1], 0  ;;  %s655_s9 = smov 0   ;;  %s657_s10 = smov 0  }
   0x6   :  { %s659_s11 = smov 0   ;;  %s661_s12 = smov 0  }
   0x7   :  { %s663_s13 = smov 0   ;;  %s665_s14 = smov 0  }
   0x8 LB: > { %s390_s15 = sadd.s32 4294967295, %s636_s14   ;;  %s391_s16 = sadd.s32 4294967294, %s636_s14   ;;  %s636_s14 = sphi %s665_s14, %s21_s14   ;;  %s632_s13 = sphi %s663_s13, %s809_s13   ;;  %s628_s12 = sphi %s661_s12, %s808_s12   ;;  %s624_s11 = sphi %s659_s11, %s807_s11   ;;  %s620_s10 = sphi %s657_s10, %s806_s10   ;;  %s616_s9 = sphi %s655_s9, %s805_s9  }
   0x9   : > { %s33_s17 = sadd.s32 1, %s632_s13  ;;  %s42_s18 = sadd.s32 1, %s624_s11 }
   0xa   : > { %p35_p0 = scmp.ge.s32.totalorder %s33_s17, 2  ;;  %p49_p1 = scmp.ne.s32.totalorder %s624_s11, %s620_s10 }
   0xb   : > { %p50_p2 = scmp.eq.s32.totalorder %s636_s14, 0  ;;  %p55_p3 = scmp.ne.s32.totalorder %s620_s10, %s616_s9 }
   0xc   : > { %s811_s17 = smov (%p35_p0, %s33_s17), 0  ;;  %p56_p5 = scmp.eq.s32.totalorder %s390_s15, 0 }
   0xd   : > { %p696_p4 = por %p50_p2, %p49_p1  ;;  %s37_s20 = ssub.s32 %s632_s13, %s811_s17 }
   0xe   : > { %p109_p6 = scmp.eq.s32.totalorder %s390_s15, 1  ;;  %p40_p7 = scmp.eq.s32.totalorder %s37_s20, 0 }
   0xf   : > { %p702_p8 = por %p56_p5, %p55_p3  ;;  %p115_p10 = scmp.eq.s32.totalorder %s391_s16, 1 }
  0x10   : > { %p706_p9 = por %p109_p6, %p49_p1  ;;  %p393_p12 = scmp.ge.s32.totalorder %s636_s14, 2 }
  0x11   : > { %s711_s23 = scalar_select %p40_p7, %s624_s11, %s42_s18  }
  0x12   : > { %p713_p11 = por %p115_p10, %p55_p3  ;;  %p428_p13 = scmp.lt.s32.totalorder %s636_s14, 2 }
  0x13   : > { %s135_s25 = sand.u32 1, %s624_s11   ;;  %s410_s27 = sshll.u32 %s632_s13, 3 }
  0x14   : > { %s394_s26 = sshll.u32 %s135_s25, 3  ;;  %s145_s30 = scalar_lea.hbm %s797_s0, %s410_s27 }
  0x15   : > { %s139_s3 = scalar_lea.vmem [#allocation2], %s394_s26  ;;  %s146_s5 = sshll.u32 %s145_s30, 4  ;;  %s147_s5 = int_to_ptr.hbm [resolvable:$true] %s146_s5 }
  0x16   : > { %s148_s4 = sshll.u32 %s139_s3, 4  ;;  %p726_p0 = pnand %p428_p13, %p696_p4  ;;  %s149_s4 = int_to_ptr.vmem [resolvable:$true] %s148_s4 }
  0x17   : > { %p399_p1 = scmp.ge.s32.totalorder %s636_s14, 1  ;;  %s136_s7 = scalar_lea.sflag [#allocation3], %s135_s25 }
  0x18   : > { %s638_s8 = smov 32   ;;  %s639_s15 = smov 2  }
  0x19   : > { %420 = dma.hbm_to_vmem [thread:$0]  (!%p726_p0), %s147_s5, 128, %s149_s4, %s136_s7, %s638_s8, %s638_s8, %s639_s15  }
  0x1a   : > { %p176_p2 = scmp.lt.s32.totalorder %s636_s14, 3  ;;  %s397_s16 = sshll.u32 %s135_s25, 1 }
  0x1b   : > { %s398_s18 = sshll.u32 %s632_s13, 1  ;;  %s162_s27 = scalar_lea.vmem [#allocation5], %s397_s16 }
  0x1c   : > { %p177_p3 = pnand %p399_p1, %p176_p2  ;;  %s167_s19 = scalar_lea.hbm %s798_s1, %s398_s18 }
  0x1d   : > { %s171_s28 = sshll.u32 %s162_s27, 4  ;;  %s169_s29 = sshll.u32 %s167_s19, 4  ;;  %s172_s28 = int_to_ptr.vmem [resolvable:$true] %s171_s28  ;;  %s170_s29 = int_to_ptr.hbm [resolvable:$true] %s169_s29 }
  0x1e   : > { %s159_s30 = scalar_lea.sflag [#allocation6], %s135_s25  ;;  %180 = sbr.rel (%p177_p3) target bundleno = 79 (0x4f), region = 28 }
  0x1f   : > { %423 = dma.hbm_to_vmem [thread:$0]  (!%p726_p0), %s170_s29, 32, %s172_s28, %s159_s30  }
  0x20   : > { %s741_s3 = sand.u32 (!%p177_p3), 1, %s620_s10  }
  0x21   : > { %s400_s4 = sshll.u32 (!%p177_p3), %s741_s3, 3  ;;  %s183_s5 = scalar_lea.sflag (!%p177_p3), [#allocation3], %s741_s3 }
  0x22   : > { %s186_s7 = scalar_lea.vmem (!%p177_p3), [#allocation2], %s400_s4 }
  0x23   : > { %603 = dma.done.wait (%p702_p8), %s183_s5, 128  }
  0x24   : > { %605 = vsyncadd (%p702_p8), %s183_s5, 4294967168  ;;  %s401_s25 = sshll.u32 %s741_s3, 1  ;;  %s193_s6 = scalar_lea.sflag [#allocation6], %s741_s3 }
  0x25   : > { %s196_s8 = scalar_lea.vmem [#allocation5], %s401_s25 }
  0x26   : > { %607 = dma.done.wait (%p702_p8), %s193_s6, 32  }
  0x27   : > { %609 = vsyncadd (%p702_p8), %s193_s6, 4294967264  ;;  %v225_v0 = vld [vmem:[%s186_s7] sm:$0x3]  ;;  %v403_v1 = vld [vmem:[%s186_s7 + $0x2] sm:$0x3]  ;;  %s407_s21 = sshll.u32 %s628_s12, 1 }
  0x28   : > { %v228_v2 = vmax.f32 %v225_v0, %v403_v1  ;;  %v404_v3 = vld [vmem:[%s186_s7 + $0x4] sm:$0x3]  ;;  %v405_v4 = vld [vmem:[%s186_s7 + $0x6] sm:$0x3]  ;;  %v223_v15 = vld [vmem:[%s196_s8] sm:$0x3]  ;;  %s280_s18 = scalar_lea.hbm %s799_s2, %s407_s21 }
  0x29   : > { %vm239_vm0 = vcmp.eq.s32.totalorder %v223_v15, 0  ;;  %vm246_vm1 = vcmp.eq.s32.totalorder %v223_v15, 1  ;;  %vm253_vm2 = vcmp.eq.s32.totalorder %v223_v15, 2  ;;  %vm260_vm3 = vcmp.eq.s32.totalorder %v223_v15, 3  ;;  %s222_s20 = scalar_lea.vmem [#allocation7], %s401_s25  ;;  %s284_s19 = sshll.u32 %s280_s18, 4  ;;  %s285_s19 = int_to_ptr.hbm [resolvable:$true] %s284_s19 }
  0x2a   : > { %v231_v5 = vmax.f32 %v228_v2, %v404_v3  ;;  %s282_s26 = sshll.u32 %s222_s20, 4  ;;  %vm224_vm4 = vcmp.ne.s32.totalorder %v223_v15, 4294967295  ;;  %s269_s12 = scalar_lea.sflag [#allocation4], %s741_s3  ;;  %s283_s26 = int_to_ptr.vmem [resolvable:$true] %s282_s26 }
  0x2b   : > { %s564_s27 = sshra.s32 %s285_s19, 4  ;;  %s570_s4 = scalar_lea.hbm %s799_s2, 4  ;;  %s565_s27 = int_to_ptr.hbm [resolvable:$true] %s564_s27 }
  0x2c   : > { %v234_v6 = vmax.f32 %v231_v5, %v405_v4  ;;  %s566_s28 = scalar_lea.hbm %s565_s27, 2  ;;  %p571_p7 = scmp.lt.s32.totalorder %s565_s27, %s799_s2 }
  0x2d   : > { %p567_p4 = scmp.ne.s32.totalorder %s565_s27, %s566_s28  ;;  %p572_p8 = scmp.lt.s32.totalorder %s570_s4, %s566_s28 }
  0x2e   : > { %v235_v7 = vsub.f32 %v225_v0, %v234_v6  ;;  %v242_v8 = vsub.f32 %v403_v1, %v234_v6  ;;  %v249_v9 = vsub.f32 %v404_v3, %v234_v6  ;;  %v256_v10 = vsub.f32 %v405_v4, %v234_v6 }
  0x2f   : > { %p568_p5 = pnand %p567_p4, %p706_p9  ;;  %p573_p10 = por %p572_p8, %p571_p7 }
  0x30   : > { %v236_v11 = vmul.f32 1.442695, %v235_v7  ;;  %v243_v12 = vmul.f32 1.442695, %v242_v8  ;;  %v250_v13 = vmul.f32 1.442695, %v249_v9 }
  0x31   : > { %v257_v14 = vmul.f32 1.442695, %v256_v10  ;;  %v240_v19 = vsel %vm239_vm0, %v235_v7, 0.0  ;;  %v247_v21 = vsel %vm246_vm1, %v242_v8, 0.0  ;;  %v254_v25 = vsel %vm253_vm2, %v249_v9, 0.0  ;;  %p569_p6 = pneg %p568_p5 }
  0x32   : > { %480 = vpow2.f32 %v236_v11  ;;  %v248_v24 = vadd.f32 %v247_v21, %v240_v19  ;;  %v261_v28 = vsel %vm260_vm3, %v256_v10, 0.0 }
  0x33   : > { %482 = vpow2.f32 %v243_v12  ;;  %p574_p13 = pnand %p573_p10, %p569_p6 }
  0x34   : > { %484 = vpow2.f32 %v250_v13  ;;  %v255_v27 = vadd.f32 %v254_v25, %v248_v24 }
  0x35   : > { %486 = vpow2.f32 %v257_v14 }
  0x36   : > { %v262_v29 = vadd.f32 %v261_v28, %v255_v27 }
  0x38   : > { %v481_v16 = vpop.eup %480 }
  0x39   : > { %v483_v17 = vpop.eup %482 }
  0x3a   : > { %v485_v18 = vpop.eup %484  ;;  %v245_v20 = vadd.f32 %v483_v17, %v481_v16 }
  0x3b   : > { %v487_v22 = vpop.eup %486 }
  0x3c   : > { %v252_v23 = vadd.f32 %v485_v18, %v245_v20 }
  0x3e   : > { %v259_v26 = vadd.f32 %v487_v22, %v252_v23 }
  0x40   : > { %488 = vlog2.f32 %v259_v26 }
  0x46   : > { %v489_v30 = vpop.eup %488 }
  0x47   : > { %v264_v31 = vmul.f32 0.6931472, %v489_v30 }
  0x49   : > { %v265_v32 = vsub.f32 %v264_v31, %v262_v29 }
  0x4b   : > { %v266_v33 = vsel %vm224_vm4, %v265_v32, 0.0 }
  0x4c   : > { %267 = vst [vmem:[%s222_s20] sm:$0x3] %v266_v33 }
  0x4d   : > { %577 = shalt.err (!%p574_p13)
}
  0x4e   : > { %415 = dma.vmem_to_hbm [thread:$0]  (%p706_p9), %s283_s26, 32, %s285_s19, %s269_s12  }
  0x4f PF: > { %s296_s3 = sand.u32 1, %s616_s9   ;;  %p425_p0 = pnand %p393_p12, %p713_p11 }
  0x50   : > { %s297_s25 = scalar_lea.sflag [#allocation4], %s296_s3 }
  0x51   : > { %p426_p1 = pneg %p425_p0 }
  0x53   : > { %611 = dma.done.wait (%p426_p1), %s297_s25, 32  }
  0x54   : > { %613 = vsyncadd (%p426_p1), %s297_s25, 4294967264  ;;  %s21_s14 = sadd.s32 1, %s636_s14   ;;  %s805_s9 = smov %s620_s10 }
  0x55   : > { %p18_p2 = scmp.ge.s32.totalorder %s21_s14, 4   ;;  %s806_s10 = smov %s624_s11 }
  0x56   : > { %s807_s11 = smov %s711_s23  ;;  %s808_s12 = smov %s632_s13 }
  0x57   : > { %s809_s13 = smov %s811_s17  ;;  %20 = sbr.rel (!%p18_p2) target bundleno = 8 (0x8), region = 89 }
  0x5c   :  { %303 = vsyncpa [#allocation3], 1 }
  0x5d   :  { %305 = vsyncpa [#allocation3 + $0x1], 1 }
  0x5e   :  { %306 = vsyncpa [#allocation6], 1 }
  0x5f   :  { %308 = vsyncpa [#allocation6 + $0x1], 1 }
  0x60   :  { %309 = vsyncpa [#allocation4], 1 }
  0x61   :  { %311 = vsyncpa [#allocation4 + $0x1], 1 }

</bundles_post_ra>
